<compile_context>
chip_gen: v7x
topology: tpu7x:2x2x1
jax: 0.10.0
libtpu: 0.0.40
codegen_flags: <defaults>
</compile_context>

<pallas_src>
import functools

import jax
import jax.numpy as jnp
from jax.experimental import pallas as pl
from jax.experimental.pallas import tpu as pltpu


def _lstm_var_recurrent_kernel(bs_ref,               # scalar prefetch (SMEM): batch_sizes [T_pad]
                               gx_ref,               # (TT, BB, 4H) precomputed x-gates + bias
                               h0_ref, c0_ref,       # (BB, H) initial hidden / cell
                               whh_ref,              # (H, 4H) fused W_hh^T (all four gates)
                               out_ref,              # (TT, BB, H) per-step hidden (padded)
                               hN_ref, cN_ref,       # (BB, H) final hidden / cell (carry)
                               *, unroll):
    bi = pl.program_id(0)          # batch-chunk axis ("parallel")
    ti = pl.program_id(1)          # time-chunk axis ("arbitrary", innermost)
    TT, BB, H4 = gx_ref.shape
    H = hN_ref.shape[1]

    # hN/cN blocks are resident across the time axis -> use them as the carry.
    @pl.when(ti == 0)
    def _():
        hN_ref[...] = h0_ref[...]
        cN_ref[...] = c0_ref[...]

    # Loop-invariant lane constants (hoisted; JAX does not CSE broadcast_in_dim).
    lane = jax.lax.broadcasted_iota(jnp.int32, (BB, H4), 1)
    is_tanh_gate = (lane >= 2 * H) & (lane < 3 * H)            # the 'g' gate block
    scale = jnp.where(is_tanh_gate, 1.0, 0.5).astype(jnp.float32)
    shift = jnp.where(is_tanh_gate, 0.0, 0.5).astype(jnp.float32)
    row = jax.lax.broadcasted_iota(jnp.int32, (BB, H), 0) + bi * BB

    wdt = whh_ref.dtype

    def step(t, carry):
        h, c = carry
        t_glob = ti * TT + t
        # ONE fused MXU dot per step: (BB, H) x (H, 4H) -> (BB, 4H), f32 accumulate.
        pre = gx_ref[t].astype(jnp.float32) + jnp.dot(
            h.astype(wdt), whh_ref[...], preferred_element_type=jnp.float32)
        # One full-lane EUP tanh gives sigmoid (0.5*tanh(0.5x)+0.5) on i/f/o lanes
        # and plain tanh on g lanes.
        gates = jnp.tanh(pre * scale) * scale + shift
        i_g = gates[:, 0 * H:1 * H]
        f_g = gates[:, 1 * H:2 * H]
        g_g = gates[:, 2 * H:3 * H]
        o_g = gates[:, 3 * H:4 * H]
        c_new = f_g * c + i_g * g_g
        h_new = o_g * jnp.tanh(c_new)

        # Rows >= batch_sizes[t] already finished: freeze their final hidden.
        active = row < bs_ref[t_glob]
        h_upd = jnp.where(active, h_new, h)
        c_upd = jnp.where(active, c_new, c)

        # TODO(synk): v5e / H<128: stage 4 steps into a (BB, 4H) buffer for
        #             lane-dense stores instead of a masked vst per step.
        out_ref[t] = h_upd.astype(out_ref.dtype)
        return (h_upd, c_upd)

    h_fin, c_fin = jax.lax.fori_loop(
        0, TT, step, (hN_ref[...], cN_ref[...]), unroll=unroll)
    hN_ref[...] = h_fin
    cN_ref[...] = c_fin


def variable_recurrent_lstm(input_packed, h0, c0, batch_sizes,
                            w_ih, w_hh, b_ih, b_hh, *,
                            compute_dtype=jnp.bfloat16,
                            t_chunk=32, b_chunk=None):
    """Pallas implementation of VariableRecurrent(LSTMCell).forward."""
    batch_sizes = [int(b) for b in batch_sizes]
    B, H = h0.shape
    N, D = input_packed.shape
    T = len(batch_sizes)
    assert B == batch_sizes[0] and N == sum(batch_sizes)
    assert min(batch_sizes) > 0, "packed sequences never contain a 0 batch size"
    assert all(batch_sizes[i] >= batch_sizes[i + 1] for i in range(T - 1))

    BB = B if b_chunk is None else int(b_chunk)
    assert B % BB == 0 and (BB == B or BB % 8 == 0)
    nb = B // BB

    TT = min(int(t_chunk), T)
    nt = -(-T // TT)
    T_pad = nt * TT
    itemsize = jnp.dtype(compute_dtype).itemsize

    # --- 1) Hoisted input projection: one big MXU matmul over ALL timesteps ---
    gx_packed = (jnp.dot(input_packed, w_ih.T, preferred_element_type=jnp.float32)
                 + (b_ih + b_hh)).astype(compute_dtype)              # (N, 4H)

    # --- 2) Packed -> padded (T_pad, B, 4H) lane-dense slab via ONE jnp gather ---
    bs_pad = jnp.asarray(batch_sizes + [0] * (T_pad - T), jnp.int32)   # (T_pad,)
    offs = jnp.concatenate([jnp.zeros((1,), jnp.int32),
                            jnp.cumsum(bs_pad)[:-1].astype(jnp.int32)])
    b_iota = jnp.arange(B, dtype=jnp.int32)
    gather_idx = offs[:, None] + jnp.minimum(b_iota[None, :], bs_pad[:, None] - 1)
    gather_idx = jnp.clip(gather_idx, 0, N - 1)      # dead rows are masked in-kernel
    gx_pad = jnp.take(gx_packed, gather_idx, axis=0)                  # (T_pad, B, 4H)

    # Fused, pre-transposed hidden weights: (H, 4H), gate blocks i|f|g|o.
    whh_t = w_hh.T.astype(compute_dtype)

    # Unroll heuristic: tiny steps are loop-overhead bound, large steps spill.
    gate_elems = BB * 4 * H
    unroll = 4 if gate_elems <= 4096 else (2 if gate_elems <= 65536 else 1)
    unroll = max(1, min(unroll, TT))

    # VMEM budget (double-buffered gx / out chunks + weights + carries).
    block_bytes = (2 * TT * BB * 4 * H * itemsize      # gx chunk, double buffered
                   + 2 * TT * BB * H * 4               # out chunk, double buffered
                   + H * 4 * H * itemsize              # W_hh^T
                   + 8 * BB * H * 4)                   # h0/c0/hN/cN blocks
    vmem_limit = int(min(max(2 * block_bytes + (4 << 20), 32 << 20), 64 << 20))

    cost = pl.CostEstimate(
        flops=int(2 * T_pad * B * H * 4 * H + 12 * T_pad * B * H),
        transcendentals=int(5 * T_pad * B * H),
        bytes_accessed=int(T_pad * B * 4 * H * itemsize + T_pad * B * H * 4
                           + H * 4 * H * itemsize + 6 * B * H * 4 + T_pad * 4))

    out_pad, h_fin, c_fin = pl.pallas_call(
        functools.partial(_lstm_var_recurrent_kernel, unroll=unroll),
        out_shape=(jax.ShapeDtypeStruct((T_pad, B, H), jnp.float32),
                   jax.ShapeDtypeStruct((B, H), jnp.float32),
                   jax.ShapeDtypeStruct((B, H), jnp.float32)),
        grid_spec=pltpu.PrefetchScalarGridSpec(
            num_scalar_prefetch=1,
            grid=(nb, nt),                              # batch chunks x time chunks
            in_specs=[
                pl.BlockSpec((TT, BB, 4 * H), lambda bi, ti, bs: (ti, bi, 0)),   # gx
                pl.BlockSpec((BB, H), lambda bi, ti, bs: (bi, 0)),               # h0
                pl.BlockSpec((BB, H), lambda bi, ti, bs: (bi, 0)),               # c0
                pl.BlockSpec((H, 4 * H), lambda bi, ti, bs: (0, 0)),             # W_hh^T
            ],
            out_specs=[
                pl.BlockSpec((TT, BB, H), lambda bi, ti, bs: (ti, bi, 0)),       # out
                pl.BlockSpec((BB, H), lambda bi, ti, bs: (bi, 0)),               # hN
                pl.BlockSpec((BB, H), lambda bi, ti, bs: (bi, 0)),               # cN
            ]),
        compiler_params=pltpu.CompilerParams(
            dimension_semantics=("parallel", "arbitrary"),
            vmem_limit_bytes=vmem_limit),
        cost_estimate=cost,
    )(bs_pad, gx_pad, h0, c0, whh_t)

    # --- 3) Padded -> packed output with ONE jnp gather (t-major, b-within-t) ---
    valid = (b_iota[None, :] < bs_pad[:, None]).reshape(-1)
    flat_idx = jnp.nonzero(valid, size=N)[0]
    output = jnp.take(out_pad.reshape(T_pad * B, H), flat_idx, axis=0)
    return (h_fin, c_fin), output


def _reference(input_packed, h0, c0, batch_sizes, w_ih, w_hh, b_ih, b_hh):
    """Pure-JAX transcription of the PyTorch VariableRecurrent loop."""
    H = h0.shape[-1]

    def cell(x, h, c):
        gates = x @ w_ih.T + b_ih + h @ w_hh.T + b_hh
        i = jax.nn.sigmoid(gates[:, :H])
        f = jax.nn.sigmoid(gates[:, H:2 * H])
        g = jnp.tanh(gates[:, 2 * H:3 * H])
        o = jax.nn.sigmoid(gates[:, 3 * H:])
        c2 = f * c + i * g
        return o * jnp.tanh(c2), c2

    hidden = (h0, c0)
    hiddens, outputs = [], []
    off, last = 0, batch_sizes[0]
    for bs in batch_sizes:
        x = input_packed[off:off + bs]
        off += bs
        dec = last - bs
        if dec > 0:
            hiddens.append((hidden[0][-dec:], hidden[1][-dec:]))
            hidden = (hidden[0][:-dec], hidden[1][:-dec])
        last = bs
        hidden = cell(x, hidden[0], hidden[1])
        outputs.append(hidden[0])
    hiddens.append(hidden)
    hiddens.reverse()
    h_fin = jnp.concatenate([h for h, _ in hiddens], 0)
    c_fin = jnp.concatenate([c for _, c in hiddens], 0)
    return (h_fin, c_fin), jnp.concatenate(outputs, 0)


if __name__ == "__main__":
    # Small, packed-sequence-consistent shapes.
    B, D, H = 8, 16, 32
    batch_sizes = [8, 7, 5, 3, 1]        # non-increasing (packed sequence)
    N = sum(batch_sizes)

    key = jax.random.PRNGKey(0)
    k_x, k_h, k_c, k_wih, k_whh, k_bih, k_bhh = jax.random.split(key, 7)

    input_packed = jax.random.normal(k_x, (N, D), jnp.float32)
    h0 = jax.random.normal(k_h, (B, H), jnp.float32)
    c0 = jax.random.normal(k_c, (B, H), jnp.float32)

    # Deterministic LSTMCell-style init: U(-1/sqrt(H), 1/sqrt(H)).
    k = 1.0 / (H ** 0.5)
    w_ih = jax.random.uniform(k_wih, (4 * H, D), jnp.float32, -k, k)
    w_hh = jax.random.uniform(k_whh, (4 * H, H), jnp.float32, -k, k)
    b_ih = jax.random.uniform(k_bih, (4 * H,), jnp.float32, -k, k)
    b_hh = jax.random.uniform(k_bhh, (4 * H,), jnp.float32, -k, k)

    (h_ref, c_ref), out_ref = _reference(
        input_packed, h0, c0, batch_sizes, w_ih, w_hh, b_ih, b_hh)

    # f32 compute path, with the time axis chunked (exercises padding + carry).
    (h_f32, c_f32), out_f32 = variable_recurrent_lstm(
        input_packed, h0, c0, batch_sizes, w_ih, w_hh, b_ih, b_hh,
        compute_dtype=jnp.float32, t_chunk=2)
    jax.block_until_ready((h_f32, c_f32, out_f32))

    assert h_f32.shape == (batch_sizes[0], H)
    assert out_f32.shape == (N, H)
    assert jnp.allclose(h_f32, h_ref, rtol=1e-3, atol=1e-3)
    assert jnp.allclose(c_f32, c_ref, rtol=1e-3, atol=1e-3)
    assert jnp.allclose(out_f32, out_ref, rtol=1e-3, atol=1e-3)

    # bf16 gate-slab / weights path (f32 accumulation + f32 carry), looser tol.
    (h_bf, c_bf), out_bf = variable_recurrent_lstm(
        input_packed, h0, c0, batch_sizes, w_ih, w_hh, b_ih, b_hh,
        compute_dtype=jnp.bfloat16)
    jax.block_until_ready((h_bf, c_bf, out_bf))

    assert jnp.allclose(h_bf, h_ref, rtol=5e-2, atol=5e-2)
    assert jnp.allclose(c_bf, c_ref, rtol=5e-2, atol=5e-2)
    assert jnp.allclose(out_bf, out_ref, rtol=5e-2, atol=5e-2)

    print("KERNEL_OK")
</pallas_src>

<mosaic_0001>
module attributes {stable_mosaic.version = 11 : i64} {
  func.func @_lstm_var_recurrent_kernel(%arg0: i32, %arg1: i32, %arg2: memref<6xi32, #tpu.memory_space<smem>>, %arg3: memref<2x8x128xf32, #tpu.memory_space<vmem>>, %arg4: memref<8x32xf32, #tpu.memory_space<vmem>>, %arg5: memref<8x32xf32, #tpu.memory_space<vmem>>, %arg6: memref<32x128xf32, #tpu.memory_space<vmem>>, %arg7: memref<2x8x32xf32, #tpu.memory_space<vmem>>, %arg8: memref<8x32xf32, #tpu.memory_space<vmem>>, %arg9: memref<8x32xf32, #tpu.memory_space<vmem>>) attributes {dimension_semantics = [#tpu.dimension_semantics<parallel>, #tpu.dimension_semantics<arbitrary>], iteration_bounds = array<i64: 1, 3>, scalar_prefetch = 1 : i64, scratch_operands = 0 : i64, tpu.core_type = #tpu.core_type<tc>, window_params = [{transform_indices = @transform_0, window_bounds = array<i64: 2, 8, 128>}, {transform_indices = @transform_1, window_bounds = array<i64: 8, 32>}, {transform_indices = @transform_2, window_bounds = array<i64: 8, 32>}, {pipeline_mode = #tpu.pipeline_mode<synchronous>, transform_indices = @transform_3, window_bounds = array<i64: 32, 128>}, {transform_indices = @transform_4, window_bounds = array<i64: 2, 8, 32>}, {transform_indices = @transform_5, window_bounds = array<i64: 8, 32>}, {transform_indices = @transform_6, window_bounds = array<i64: 8, 32>}]} {
    %c0_i32 = arith.constant 0 : i32
    %0 = arith.cmpi eq, %arg1, %c0_i32 : i32
    %1 = arith.extui %0 : i1 to i32
    %c0_i32_0 = arith.constant 0 : i32
    %2 = arith.cmpi ne, %1, %c0_i32_0 : i32
    scf.if %2 {
      %c0_28 = arith.constant 0 : index
      %c0_29 = arith.constant 0 : index
      %85 = vector.load %arg4[%c0_28, %c0_29] : memref<8x32xf32, #tpu.memory_space<vmem>>, vector<8x32xf32>
      %c0_30 = arith.constant 0 : index
      %c0_31 = arith.constant 0 : index
      %86 = vector.load %arg8[%c0_30, %c0_31] : memref<8x32xf32, #tpu.memory_space<vmem>>, vector<8x32xf32>
      tpu.vector_store %arg8[%c0_30, %c0_31], %85 {strides = array<i32>} : memref<8x32xf32, #tpu.memory_space<vmem>>, vector<8x32xf32>,
      %c0_32 = arith.constant 0 : index
      %c0_33 = arith.constant 0 : index
      %87 = vector.load %arg5[%c0_32, %c0_33] : memref<8x32xf32, #tpu.memory_space<vmem>>, vector<8x32xf32>
      %c0_34 = arith.constant 0 : index
      %c0_35 = arith.constant 0 : index
      %88 = vector.load %arg9[%c0_34, %c0_35] : memref<8x32xf32, #tpu.memory_space<vmem>>, vector<8x32xf32>
      tpu.vector_store %arg9[%c0_34, %c0_35], %87 {strides = array<i32>} : memref<8x32xf32, #tpu.memory_space<vmem>>, vector<8x32xf32>,
    } else {
    }
    %3 = tpu.iota {dimensions = array<i32: 1>} : vector<8x128xi32>
    %c64_i32 = arith.constant 64 : i32
    %4 = vector.broadcast %c64_i32 : i32 to vector<8x128xi32>
    %5 = arith.cmpi sge, %3, %4 : vector<8x128xi32>
    %c96_i32 = arith.constant 96 : i32
    %6 = vector.broadcast %c96_i32 : i32 to vector<8x128xi32>
    %7 = arith.cmpi slt, %3, %6 : vector<8x128xi32>
    %8 = arith.andi %5, %7 : vector<8x128xi1>
    %cst = arith.constant 1.000000e+00 : f32
    %cst_1 = arith.constant 5.000000e-01 : f32
    %9 = vector.broadcast %cst : f32 to vector<8x128xf32>
    %10 = vector.broadcast %cst_1 : f32 to vector<8x128xf32>
    %11 = arith.select %8, %9, %10 : vector<8x128xi1>, vector<8x128xf32>
    %cst_2 = arith.constant 0.000000e+00 : f32
    %cst_3 = arith.constant 5.000000e-01 : f32
    %12 = vector.broadcast %cst_2 : f32 to vector<8x128xf32>
    %13 = vector.broadcast %cst_3 : f32 to vector<8x128xf32>
    %14 = arith.select %8, %12, %13 : vector<8x128xi1>, vector<8x128xf32>
    %15 = tpu.iota {dimensions = array<i32: 0>} : vector<8x32xi32>
    %c8_i32 = arith.constant 8 : i32
    %16 = arith.muli %arg0, %c8_i32 : i32
    %17 = vector.broadcast %16 : i32 to vector<8x32xi32>
    %18 = arith.addi %15, %17 : vector<8x32xi32>
    %c0 = arith.constant 0 : index
    %c0_4 = arith.constant 0 : index
    %19 = vector.load %arg8[%c0, %c0_4] : memref<8x32xf32, #tpu.memory_space<vmem>>, vector<8x32xf32>
    %c0_5 = arith.constant 0 : index
    %c0_6 = arith.constant 0 : index
    %20 = vector.load %arg9[%c0_5, %c0_6] : memref<8x32xf32, #tpu.memory_space<vmem>>, vector<8x32xf32>
    %c0_i32_7 = arith.constant 0 : i32
    %c2_i32 = arith.constant 2 : i32
    %21 = arith.muli %arg1, %c2_i32 : i32
    %22 = arith.addi %21, %c0_i32_7 : i32
    %23 = arith.index_cast %c0_i32_7 : i32 to index
    %c0_8 = arith.constant 0 : index
    %c0_9 = arith.constant 0 : index
    %24 = vector.load %arg3[%23, %c0_8, %c0_9] : memref<2x8x128xf32, #tpu.memory_space<vmem>>, vector<1x8x128xf32>
    %25 = vector.shape_cast %24 : vector<1x8x128xf32> to vector<8x128xf32>
    %c0_10 = arith.constant 0 : index
    %c0_11 = arith.constant 0 : index
    %26 = vector.load %arg6[%c0_10, %c0_11] : memref<32x128xf32, #tpu.memory_space<vmem>>, vector<32x128xf32>
    %cst_12 = arith.constant dense<0.000000e+00> : vector<8x128xf32>
    %27 = tpu.matmul %19, %26, %cst_12 {dimension_numbers = #tpu.dot_dimension_numbers<[1], [0], [0], [1], [0, 0, 1, 1], [], []>} : vector<8x32xf32>, vector<32x128xf32>, vector<8x128xf32> -> vector<8x128xf32>
    %28 = arith.addf %25, %27 : vector<8x128xf32>
    %29 = arith.mulf %28, %11 : vector<8x128xf32>
    %30 = math.tanh %29 : vector<8x128xf32>
    %31 = arith.mulf %30, %11 : vector<8x128xf32>
    %32 = arith.addf %31, %14 : vector<8x128xf32>
    %33 = vector.extract_strided_slice %32 {offsets = [0, 0], sizes = [8, 32], strides = [1, 1]} : vector<8x128xf32> to vector<8x32xf32>
    %34 = vector.extract_strided_slice %32 {offsets = [0, 32], sizes = [8, 32], strides = [1, 1]} : vector<8x128xf32> to vector<8x32xf32>
    %35 = vector.extract_strided_slice %32 {offsets = [0, 64], sizes = [8, 32], strides = [1, 1]} : vector<8x128xf32> to vector<8x32xf32>
    %36 = vector.extract_strided_slice %32 {offsets = [0, 96], sizes = [8, 32], strides = [1, 1]} : vector<8x128xf32> to vector<8x32xf32>
    %37 = arith.mulf %34, %20 : vector<8x32xf32>
    %38 = arith.mulf %33, %35 : vector<8x32xf32>
    %39 = arith.addf %37, %38 : vector<8x32xf32>
    %40 = math.tanh %39 : vector<8x32xf32>
    %41 = arith.mulf %36, %40 : vector<8x32xf32>
    %42 = arith.index_cast %22 : i32 to index
    %43 = memref.load %arg2[%42] : memref<6xi32, #tpu.memory_space<smem>>
    %44 = vector.broadcast %43 : i32 to vector<8x32xi32>
    %45 = arith.cmpi slt, %18, %44 : vector<8x32xi32>
    %46 = arith.select %45, %41, %19 : vector<8x32xi1>, vector<8x32xf32>
    %47 = arith.select %45, %39, %20 : vector<8x32xi1>, vector<8x32xf32>
    %48 = arith.index_cast %c0_i32_7 : i32 to index
    %c0_13 = arith.constant 0 : index
    %c0_14 = arith.constant 0 : index
    %49 = vector.load %arg7[%48, %c0_13, %c0_14] : memref<2x8x32xf32, #tpu.memory_space<vmem>>, vector<1x8x32xf32>
    %50 = vector.shape_cast %49 : vector<1x8x32xf32> to vector<8x32xf32>
    %51 = vector.shape_cast %46 : vector<8x32xf32> to vector<1x8x32xf32>
    tpu.vector_store %arg7[%48, %c0_13, %c0_14], %51 {strides = array<i32>} : memref<2x8x32xf32, #tpu.memory_space<vmem>>, vector<1x8x32xf32>,
    %c1_i32 = arith.constant 1 : i32
    %c2_i32_15 = arith.constant 2 : i32
    %52 = arith.muli %arg1, %c2_i32_15 : i32
    %53 = arith.addi %52, %c1_i32 : i32
    %54 = arith.index_cast %c1_i32 : i32 to index
    %c0_16 = arith.constant 0 : index
    %c0_17 = arith.constant 0 : index
    %55 = vector.load %arg3[%54, %c0_16, %c0_17] : memref<2x8x128xf32, #tpu.memory_space<vmem>>, vector<1x8x128xf32>
    %56 = vector.shape_cast %55 : vector<1x8x128xf32> to vector<8x128xf32>
    %c0_18 = arith.constant 0 : index
    %c0_19 = arith.constant 0 : index
    %57 = vector.load %arg6[%c0_18, %c0_19] : memref<32x128xf32, #tpu.memory_space<vmem>>, vector<32x128xf32>
    %cst_20 = arith.constant dense<0.000000e+00> : vector<8x128xf32>
    %58 = tpu.matmul %46, %57, %cst_20 {dimension_numbers = #tpu.dot_dimension_numbers<[1], [0], [0], [1], [0, 0, 1, 1], [], []>} : vector<8x32xf32>, vector<32x128xf32>, vector<8x128xf32> -> vector<8x128xf32>
    %59 = arith.addf %56, %58 : vector<8x128xf32>
    %60 = arith.mulf %59, %11 : vector<8x128xf32>
    %61 = math.tanh %60 : vector<8x128xf32>
    %62 = arith.mulf %61, %11 : vector<8x128xf32>
    %63 = arith.addf %62, %14 : vector<8x128xf32>
    %64 = vector.extract_strided_slice %63 {offsets = [0, 0], sizes = [8, 32], strides = [1, 1]} : vector<8x128xf32> to vector<8x32xf32>
    %65 = vector.extract_strided_slice %63 {offsets = [0, 32], sizes = [8, 32], strides = [1, 1]} : vector<8x128xf32> to vector<8x32xf32>
    %66 = vector.extract_strided_slice %63 {offsets = [0, 64], sizes = [8, 32], strides = [1, 1]} : vector<8x128xf32> to vector<8x32xf32>
    %67 = vector.extract_strided_slice %63 {offsets = [0, 96], sizes = [8, 32], strides = [1, 1]} : vector<8x128xf32> to vector<8x32xf32>
    %68 = arith.mulf %65, %47 : vector<8x32xf32>
    %69 = arith.mulf %64, %66 : vector<8x32xf32>
    %70 = arith.addf %68, %69 : vector<8x32xf32>
    %71 = math.tanh %70 : vector<8x32xf32>
    %72 = arith.mulf %67, %71 : vector<8x32xf32>
    %73 = arith.index_cast %53 : i32 to index
    %74 = memref.load %arg2[%73] : memref<6xi32, #tpu.memory_space<smem>>
    %75 = vector.broadcast %74 : i32 to vector<8x32xi32>
    %76 = arith.cmpi slt, %18, %75 : vector<8x32xi32>
    %77 = arith.select %76, %72, %46 : vector<8x32xi1>, vector<8x32xf32>
    %78 = arith.select %76, %70, %47 : vector<8x32xi1>, vector<8x32xf32>
    %79 = arith.index_cast %c1_i32 : i32 to index
    %c0_21 = arith.constant 0 : index
    %c0_22 = arith.constant 0 : index
    %80 = vector.load %arg7[%79, %c0_21, %c0_22] : memref<2x8x32xf32, #tpu.memory_space<vmem>>, vector<1x8x32xf32>
    %81 = vector.shape_cast %80 : vector<1x8x32xf32> to vector<8x32xf32>
    %82 = vector.shape_cast %77 : vector<8x32xf32> to vector<1x8x32xf32>
    tpu.vector_store %arg7[%79, %c0_21, %c0_22], %82 {strides = array<i32>} : memref<2x8x32xf32, #tpu.memory_space<vmem>>, vector<1x8x32xf32>,
    %c2_i32_23 = arith.constant 2 : i32
    %c0_24 = arith.constant 0 : index
    %c0_25 = arith.constant 0 : index
    %83 = vector.load %arg8[%c0_24, %c0_25] : memref<8x32xf32, #tpu.memory_space<vmem>>, vector<8x32xf32>
    tpu.vector_store %arg8[%c0_24, %c0_25], %77 {strides = array<i32>} : memref<8x32xf32, #tpu.memory_space<vmem>>, vector<8x32xf32>,
    %c0_26 = arith.constant 0 : index
    %c0_27 = arith.constant 0 : index
    %84 = vector.load %arg9[%c0_26, %c0_27] : memref<8x32xf32, #tpu.memory_space<vmem>>, vector<8x32xf32>
    tpu.vector_store %arg9[%c0_26, %c0_27], %78 {strides = array<i32>} : memref<8x32xf32, #tpu.memory_space<vmem>>, vector<8x32xf32>,
    return
  }
  func.func @transform_0(%arg0: i32, %arg1: i32, %arg2: memref<6xi32, #tpu.memory_space<smem>>) -> (i32, i32, i32) {
    %c0_i32 = arith.constant 0 : i32
    %c0_i32_0 = arith.constant 0 : i32
    return %arg1, %arg0, %c0_i32 : i32, i32, i32
  }
  func.func @transform_1(%arg0: i32, %arg1: i32, %arg2: memref<6xi32, #tpu.memory_space<smem>>) -> (i32, i32) {
    %c0_i32 = arith.constant 0 : i32
    %c0_i32_0 = arith.constant 0 : i32
    return %arg0, %c0_i32 : i32, i32
  }
  func.func @transform_2(%arg0: i32, %arg1: i32, %arg2: memref<6xi32, #tpu.memory_space<smem>>) -> (i32, i32) {
    %c0_i32 = arith.constant 0 : i32
    %c0_i32_0 = arith.constant 0 : i32
    return %arg0, %c0_i32 : i32, i32
  }
  func.func @transform_3(%arg0: i32, %arg1: i32, %arg2: memref<6xi32, #tpu.memory_space<smem>>) -> (i32, i32) {
    %c0_i32 = arith.constant 0 : i32
    %c0_i32_0 = arith.constant 0 : i32
    %c0_i32_1 = arith.constant 0 : i32
    return %c0_i32, %c0_i32_0 : i32, i32
  }
  func.func @transform_4(%arg0: i32, %arg1: i32, %arg2: memref<6xi32, #tpu.memory_space<smem>>) -> (i32, i32, i32) {
    %c0_i32 = arith.constant 0 : i32
    %c0_i32_0 = arith.constant 0 : i32
    return %arg1, %arg0, %c0_i32 : i32, i32, i32
  }
  func.func @transform_5(%arg0: i32, %arg1: i32, %arg2: memref<6xi32, #tpu.memory_space<smem>>) -> (i32, i32) {
    %c0_i32 = arith.constant 0 : i32
    %c0_i32_0 = arith.constant 0 : i32
    return %arg0, %c0_i32 : i32, i32
  }
  func.func @transform_6(%arg0: i32, %arg1: i32, %arg2: memref<6xi32, #tpu.memory_space<smem>>) -> (i32, i32) {
    %c0_i32 = arith.constant 0 : i32
    %c0_i32_0 = arith.constant 0 : i32
    return %arg0, %c0_i32 : i32, i32
  }
}

</mosaic_0001>

<bundles_post_ra>
// kernel: tpu_custom_call.1
= control target key start
LH: loop header
LB: loop body
LE: loop exit
PB: predicated region body
PF: predicated region fallthrough
CT: control target
= control target key end

     0   :  { %s1653_s0 = inlined_call_operand.hbm [shape: s32[6], index: 0, kind: input, shape index: {}]   ;;  %s1654_s1 = inlined_call_operand.hbm [shape: f32[6,8,128], index: 1, kind: input, shape index: {}]   ;;  %s1655_s2 = inlined_call_operand.hbm [shape: f32[8,32], index: 2, kind: input, shape index: {}]   ;;  %s1656_s3 = inlined_call_operand.vmem [shape: f32[8,32], index: 3, kind: input, shape index: {}]   ;;  %s1657_s4 = inlined_call_operand.hbm [shape: f32[32,128], index: 4, kind: input, shape index: {}]   ;;  %s1658_s5 = inlined_call_operand.hbm [shape: f32[6,8,32], index: 5, kind: output, shape index: {0}]   ;;  %s1659_s6 = inlined_call_operand.hbm [shape: f32[8,32], index: 6, kind: output, shape index: {1}]   ;;  %s1660_s7 = inlined_call_operand.hbm [shape: f32[8,32], index: 7, kind: output, shape index: {2}]  }
   0x1   :  { %1672 = sst [smem:[#allocation21_spill]] %s1655_s2  ;;  %s991_s26 = scalar_lea.hbm %s1653_s0, 16 }
   0x2   :  { %p992_p0 = scmp.ne.s32.totalorder %s1653_s0, %s991_s26  ;;  %p995_p1 = scmp.lt.u32.totalorder %s991_s26, %s1653_s0 }
   0x4   :  { %p997_p2 = pnand %p995_p1, %p992_p0 }
   0x6   :  { %1000 = shalt.err (!%p997_p2)  }
   0x7   :  { %s1233_s8 = smov [#allocation3]  }
   0x8   :  { %14 = dma.hbm_to_smem %s1653_s0, 16, %s1233_s8, [#allocation2] }
   0x9   :  { %1191 = dma.done.wait [#allocation2], 16 }
   0xa   :  { %1192 = vsyncadd [#allocation2], 4294967280 }
   0xb   :  { %16 = sfence }
   0xc   :  { %17 = vsyncpa [#allocation5], 0 }
   0xd   :  { %19 = vsyncpa [#allocation5 + $0x1], 0 }
   0xe   :  { %20 = vsyncpa [#allocation8], 0 }
   0xf   :  { %21 = vsyncpa [#allocation6], 0 }
  0x10   :  { %23 = vsyncpa [#allocation6 + $0x1], 0 }
  0x11   :  { %24 = vsyncpa [#allocation12], 0  ;;  %s1303_s11 = smov 0   ;;  %s1305_s12 = smov 0  }
  0x12   :  { %s1307_s13 = smov 0   ;;  %s1309_s14 = smov 0  }
  0x13   :  { %s1311_s15 = smov 0   ;;  %s1313_s0 = smov 0  }
  0x14 LB: > { %1673 = sst [smem:[#allocation19_spill]] %s1211_s11  ;;  %s798_s16 = sadd.s32 4294967295, %s1231_s0   ;;  %s1231_s0 = sphi %s1313_s0, %s30_s0   ;;  %s1227_s15 = sphi %s1311_s15, %s1703_s15   ;;  %s1223_s14 = sphi %s1309_s14, %s1702_s14   ;;  %s1219_s13 = sphi %s1307_s13, %s1701_s13   ;;  %s1215_s12 = sphi %s1305_s12, %s1700_s12   ;;  %s1211_s11 = sphi %s1303_s11, %s1699_s11  }
  0x15   : > { %s799_s17 = sadd.s32 4294967294, %s1231_s0   ;;  %p58_p3 = scmp.ne.s32.totalorder %s1219_s13, %s1215_s12 }
  0x16   : > { %p59_p4 = scmp.eq.s32.totalorder %s1231_s0, 0  ;;  %p64_p5 = scmp.ne.s32.totalorder %s1215_s12, %s1211_s11 }
  0x17   : > { %p1340_p6 = scmp.eq.s32.totalorder %s798_s16, 0  ;;  %p1344_p7 = scmp.eq.s32.totalorder %s798_s16, 2 }
  0x18   : > { %p1348_p8 = por %p59_p4, %p58_p3  ;;  %p169_p9 = scmp.eq.s32.totalorder %s799_s17, 2 }
  0x19   : > { %s1674_s18 = scalar_select %p1340_p6, 1, 0 }
  0x1a   : > { %s1675_s19 = scalar_select %p1344_p7, 1, 0 }
  0x1b   : > { %p1354_p10 = por %p1340_p6, %p64_p5  ;;  %p1360_p11 = por %p1344_p7, %p58_p3 }
  0x1c   : > { %p1364_p12 = por %p169_p9, %p64_p5  ;;  %p800_p13 = scmp.ge.s32.totalorder %s1231_s0, 1 }
  0x1d   : > { %s1677_s21 = scalar_select %p1354_p10, 1, 0 }
  0x1e   : > { %s1678_s22 = scalar_select %p1360_p11, 1, 0 }
  0x1f   : > { %s1679_s23 = scalar_select %p1364_p12, 1, 0 }
  0x20   : > { %p228_p0 = scmp.lt.s32.totalorder %s1231_s0, 4  ;;  %s1234_s25 = smov [#allocation7]  }
  0x21   : > { %1680 = sst [smem:[#allocation20_spill]] %s1679_s23  ;;  %s243_s26 = sshll.u32 %s1234_s25, 4  ;;  %s244_s26 = int_to_ptr.vmem [resolvable:$true] %s243_s26 }
  0x22   : > { %p1370_p1 = pnand %p800_p13, %p228_p0  ;;  %p911_p2 = scmp.lt.s32.totalorder %s1231_s0, 3 }
  0x23   : > { %s1235_s28 = smov [#allocation9]   ;;  %s1684_s2 = sld [smem:[#allocation21_spill]] }
  0x24   : > { %s1681_s24 = scalar_select %p1370_p1, 1, 0 }
  0x25   : > { %p894_p3 = pneg %p1370_p1  ;;  %p1379_p4 = pnand %p911_p2, %p1348_p8 }
  0x26   : > { %s260_s29 = sshll.u32 %s1235_s28, 4  ;;  %s1389_s29 = int_to_ptr.vmem [resolvable:$true] %s260_s29 }
  0x27   : > { %s1682_s27 = scalar_select %p1379_p4, 1, 0 }
  0x28   : > { %p1385_p5 = pnand %p894_p3, %p1340_p6 }
  0x29   : > { %s1001_s10 = scalar_lea.hbm %s1684_s2, 128 }
  0x2a   : > { %p1002_p8 = scmp.ne.s32.totalorder %s1684_s2, %s1001_s10  ;;  %p1003_p9 = pneg %p1385_p5 }
  0x2b   : > { %p1008_p2 = scmp.lt.u32.totalorder %s1001_s10, %s1684_s2 }
  0x2c   : > { %p1004_p13 = pnand %p1003_p9, %p1002_p8 }
  0x2e   : > { %p1005_p0 = pneg %p1004_p13 }
  0x30   : > { %p1010_p3 = pnand %p1008_p2, %p1005_p0 }
  0x32   : > { %1013 = shalt.err (!%p1010_p3)
}
  0x33   : > { %s1014_s28 = scalar_lea.vmem %s244_s26, 128  ;;  %p1022_p6 = scmp.lt.s32.totalorder %s244_s26, %s244_s26 }
  0x34   : > { %p1015_p12 = scmp.ne.s32.totalorder %s244_s26, %s1014_s28  ;;  %p1023_p10 = scmp.lt.s32.totalorder %s1014_s28, %s1014_s28 }
  0x36   : > { %p1017_p11 = pnand %p1015_p12, %p1003_p9  ;;  %p1024_p1 = por %p1023_p10, %p1022_p6 }
  0x38   : > { %p1018_p7 = pneg %p1017_p11 }
  0x3a   : > { %p1025_p4 = pnand %p1024_p1, %p1018_p7 }
  0x3c   : > { %1028 = shalt.err (!%p1025_p4)
}
  0x3d   : > { %897 = dma.hbm_to_vmem [thread:$0]  (!%p1385_p5), %s1684_s2, 128, %s244_s26, [#allocation8]  }
  0x3e   : > { %s1029_s17 = scalar_lea.hbm %s1657_s4, 512 }
  0x3f   : > { %p1030_p11 = scmp.ne.s32.totalorder %s1657_s4, %s1029_s17  ;;  %p1036_p10 = scmp.lt.u32.totalorder %s1029_s17, %s1657_s4 }
  0x41   : > { %p1032_p6 = pnand %p1030_p11, %p1003_p9 }
  0x43   : > { %p1033_p7 = pneg %p1032_p6 }
  0x45   : > { %p1038_p12 = pnand %p1036_p10, %p1033_p7 }
  0x47   : > { %1041 = shalt.err (!%p1038_p12)
}
  0x48   : > { %s1042_s26 = scalar_lea.vmem %s1389_s29, 512  ;;  %p1050_p13 = scmp.lt.s32.totalorder %s1389_s29, %s1389_s29 }
  0x49   : > { %p1043_p1 = scmp.ne.s32.totalorder %s1389_s29, %s1042_s26  ;;  %p1051_p0 = scmp.lt.s32.totalorder %s1042_s26, %s1042_s26 }
  0x4b   : > { %p1045_p4 = pnand %p1043_p1, %p1003_p9  ;;  %p1052_p2 = por %p1051_p0, %p1050_p13 }
  0x4d   : > { %p1046_p8 = pneg %p1045_p4 }
  0x4f   : > { %p1053_p3 = pnand %p1052_p2, %p1046_p8 }
  0x51   : > { %1056 = shalt.err (!%p1053_p3)
}
  0x52   : > { %s1671_s23 = smov 128   ;;  %s1237_s8 = smov 8  }
  0x53   : > { %900 = dma.hbm_to_vmem [thread:$0]  (!%p1385_p5), %s1657_s4, 512, %s1389_s29, [#allocation8], %s1671_s23, %s1671_s23, %s1237_s8  }
  0x54   : > { %s274_s16 = sand.u32 1, %s1219_s13   ;;  %s39_s17 = sadd.s32 1, %s1227_s15 }
  0x55   : > { %s805_s20 = sshll.u32 %s274_s16, 4  ;;  %p40_p9 = scmp.ge.s32.totalorder %s39_s17, 3 }
  0x56   : > { %s828_s25 = sshll.u32 %s1227_s15, 8  ;;  %s278_s28 = scalar_lea.vmem [#allocation4], %s805_s20 }
  0x57   : > { %s286_s26 = sshll.u32 %s278_s28, 4  ;;  %s1705_s17 = smov (%p40_p9, %s39_s17), 0  ;;  %s1451_s26 = int_to_ptr.vmem [resolvable:$true] %s286_s26 }
  0x58   : > { %s1449_s11 = scalar_lea.hbm %s1654_s1, %s828_s25  ;;  %s46_s9 = ssub.s32 %s1227_s15, %s1705_s17 }
  0x59   : > { %p1456_p5 = scmp.eq.s32.totalorder %s46_s9, 0  ;;  %s1460_s20 = scalar_lea.sflag [#allocation5], %s274_s16 }
  0x5a   : > { %s1057_s28 = scalar_lea.hbm %s1449_s11, 256  ;;  %p1686_p6 = scmp.ne.s32.totalorder %s1682_s27, 0 }
  0x5b   : > { %p1058_p11 = scmp.ne.s32.totalorder %s1449_s11, %s1057_s28  ;;  %s1062_s30 = scalar_lea.hbm %s1654_s1, 768 }
  0x5c   : > { %p1059_p7 = pneg %p1686_p6  ;;  %p1063_p1 = scmp.lt.u32.totalorder %s1449_s11, %s1654_s1 }
  0x5d   : > { %p1064_p4 = scmp.lt.u32.totalorder %s1062_s30, %s1057_s28  ;;  %p1066_p13 = scmp.lt.u32.totalorder %s1057_s28, %s1449_s11 }
  0x5e   : > { %p1060_p10 = pnand %p1059_p7, %p1058_p11 }
  0x5f   : > { %p1065_p8 = por %p1064_p4, %p1063_p1 }
  0x60   : > { %p1061_p12 = pneg %p1060_p10 }
  0x61   : > { %p1067_p0 = por %p1066_p13, %p1065_p8 }
  0x63   : > { %p1068_p2 = pnand %p1067_p0, %p1061_p12 }
  0x65   : > { %1071 = shalt.err (!%p1068_p2)
}
  0x66   : > { %s1072_s16 = scalar_lea.vmem %s1451_s26, 256  ;;  %s1238_s9 = smov [#allocation4]  }
  0x67   : > { %p1073_p3 = scmp.ne.s32.totalorder %s1451_s26, %s1072_s16  ;;  %s1077_s2 = sshll.u32 %s1238_s9, 4  ;;  %s1078_s2 = int_to_ptr.vmem [resolvable:$false] %s1077_s2 }
  0x68   : > { %s1079_s23 = scalar_lea.vmem %s1078_s2, 512  ;;  %p1080_p10 = scmp.lt.s32.totalorder %s1451_s26, %s1078_s2 }
  0x69   : > { %p1075_p9 = pnand %p1073_p3, %p1059_p7  ;;  %p1081_p1 = scmp.lt.s32.totalorder %s1079_s23, %s1072_s16 }
  0x6b   : > { %p1076_p11 = pneg %p1075_p9  ;;  %p1082_p4 = por %p1081_p1, %p1080_p10 }
  0x6d   : > { %p1083_p8 = pnand %p1082_p4, %p1076_p11 }
  0x6f   : > { %1086 = shalt.err (!%p1083_p8)
}
  0x70   : > { %s1687_s29 = smov 128   ;;  %s1688_s28 = sadd.s32 1, %s1219_s13 }
  0x71   : > { %904 = dma.hbm_to_vmem [thread:$0]  (!%p1686_p6), %s1449_s11, 256, %s1451_s26, %s1460_s20, %s1687_s29, %s1687_s29, %s1237_s8  }
  0x72   : > { %s1496_s25 = scalar_select %p1456_p5, %s1219_s13, %s1688_s28  }
  0x73   : > { %p1689_p7 = scmp.ne.s32.totalorder %s1681_s24, 0 }
  0x74   : > { %s1501_s27 = sand.u32 (!%p1689_p7), 1, %s1215_s12   ;;  %p1690_p12 = scmp.ne.s32.totalorder (!%p1689_p7), %s1677_s21, 0 }
  0x75   : > { %298 = sbr.rel (%p1689_p7) target bundleno = 1626 (0x65a), region = 36  ;;  %s809_s30 = sshll.u32 (!%p1689_p7), %s1501_s27, 4 }
  0x76   : > { %s301_s16 = scalar_lea.sflag (!%p1689_p7), [#allocation5], %s1501_s27  ;;  %s1505_s9 = scalar_lea.vmem (!%p1689_p7), [#allocation4], %s809_s30 }
  0x7c   : > { %1194 = dma.done.wait (%p1690_p12), %s301_s16, 256  }
  0x7d   : > { %1196 = vsyncadd (%p1690_p12), %s301_s16, 4294967040  ;;  %p1691_p5 = scmp.ne.s32.totalorder %s1674_s18, 0 }
  0x7f   : > { %1198 = dma.done.wait (%p1691_p5), [#allocation8], 640  }
  0x80   : > { %1200 = vsyncadd (%p1691_p5), [#allocation8], 4294966656  ;;  %s1515_s11 = scalar_lea.vmem [#allocation10], %s809_s30  ;;  %p813_p6 = scmp.ne.s32.totalorder %s1223_s14, 0 }
  0x81   : > { %v355_v0 = vld [vmem:[#allocation7] sm:$0xff] (!%p813_p6)  ;;  %vm356_vm0 = vcmask (!%p813_p6), 261120   ;;  %v358_v1 = vld [vmem:[%s1656_s3] sm:$0xff] (!%p813_p6) }
  0x82   : > { %354 = sbr.rel (%p813_p6) target bundleno = 137 (0x89), region = 52  ;;  %357 = vst.msk [vmem:[#allocation11] sm:$0xff] (!%p813_p6), %vm356_vm0, %v355_v0  ;;  %359 = vst.msk [vmem:[#allocation13] sm:$0xff] (!%p813_p6), %vm356_vm0, %v358_v1 }
  0x89 PF: > { %v376_v2 = vld [vmem:[#allocation9] sm:$0xff]  ;;  %v377_v3 = vld [vmem:[#allocation9 + $0x8] sm:$0xff]  ;;  %v378_v4 = vld [vmem:[#allocation9 + $0x10] sm:$0xff]  ;;  %v1239_v5 = vmov 0.0|0.0   ;;  %vm1240_vm1 = vmmov 0   ;;  %v1241_v8 = vmov 0.0   ;;  %v360_v11 = vlaneseq }
  0x8a   : > { %862 = vmatprep.subr.bf16.mxu0 %v1239_v5  ;;  %v863_v6 = vpack.c.bf16 %v377_v3, %v376_v2  ;;  %v379_v7 = vld [vmem:[#allocation9 + $0x18] sm:$0xff]  ;;  %848 = vmatprep.mubr.msk.f32.mxu0 %vm1240_vm1, %v1241_v8  ;;  %v372_v10 = vld [vmem:[#allocation11] sm:$0xff]  ;;  %vm380_vm2 = vcmask 261120   ;;  %v1242_v14 = vmov 0.5   ;;  %s1243_s18 = smov 64   ;;  %v373_v24 = vld [vmem:[#allocation13] sm:$0xff] }
  0x8b   : > { %868 = vmatprep.subr.bf16.mxu1 %v1239_v5  ;;  %859 = vmatprep.mubr.msk.f32.mxu1 %vm1240_vm1, %v1241_v8  ;;  %v866_v9 = vpack.c.bf16 %v379_v7, %v378_v4  ;;  %v361_v12 = vand.u32 127, %v360_v11  ;;  %v375_v13 = vld [vmem:[%s1505_s9] sm:$0xff]  ;;  %s1244_s21 = smov 32   ;;  %s1245_s26 = smov 96   ;;  %v368_v32 = vshrl.u32 %v360_v11, 7  ;;  %v816_v40 = vld [vmem:[%s1505_s9 + $0x8] sm:$0xff] }
  0x8c   : > { %864 = vmatpush3.bf16.msra.mxu0 %v863_v6  ;;  %870 = vmatpush3.bf16.msra.mxu1 %v863_v6  ;;  %s814_s10 = sshll.u32 %s1223_s14, 1  ;;  %s1246_s29 = smov [#allocation11]  }
  0x8d   : > { %865 = vmatprep.subr.bf16.mxu0 %v1239_v5  ;;  %871 = vmatprep.subr.bf16.mxu1 %v1239_v5  ;;  %vm362_vm3 = vcmp.ge.s32.totalorder %v361_v12, 64  ;;  %vm363_vm4 = vcmp.lt.s32.totalorder %v361_v12, 96  ;;  %s480_s20 = sld [smem:[#allocation3 + %s814_s10]]  ;;  %s493_s2 = sadd.s32 1, %s814_s10 }
  0x8e   : > { %vm364_vm5 = vmand %vm362_vm3, %vm363_vm4  ;;  %s594_s23 = sld [smem:[#allocation3 + %s493_s2]]  ;;  %s642_s28 = sshll.u32 %s1246_s29, 4  ;;  %s643_s28 = int_to_ptr.vmem [resolvable:$true] %s642_s28 }
  0x8f   : > { %v365_v15 = vsel %vm364_vm5, 1.0, %v1242_v14  ;;  %v366_v21 = vsel %vm364_vm5, 0.0, %v1242_v14  ;;  %s829_s30 = sshll.u32 %s1223_s14, 8  ;;  %s626_s16 = sshll.u32 %s1515_s11, 4  ;;  %s1555_s16 = int_to_ptr.vmem [resolvable:$true] %s626_s16 }
  0x90   : > { %867 = vmatpush3.bf16.msra.mxu0 %v866_v9  ;;  %873 = vmatpush3.bf16.msra.mxu1 %v866_v9  ;;  %s1247_s9 = smov [#allocation13]   ;;  %p1694_p0 = scmp.ne.s32.totalorder %s1675_s19, 0 }
  0x91   : > { %s655_s24 = sshll.u32 %s1247_s9, 4  ;;  %p1094_p9 = scmp.lt.s32.totalorder %s643_s28, %s643_s28  ;;  %s1560_s24 = int_to_ptr.vmem [resolvable:$true] %s655_s24 }
  0x93   : > { %849 = vmatmul.mubr.msk.f32.vlgmr.msra.gmra.mrb[0].mxu0 %vm380_vm2, %v372_v10  ;;  %v481_v33 = vstv %s480_s20 }
  0x94   : > { %vm1529_vm6 = vcmp.lt.s32.totalorder %v368_v32, %v481_v33  ;;  %v595_v54 = vstv %s594_s23 }
  0x95   : > { %vm596_vm7 = vcmp.lt.s32.totalorder %v368_v32, %v595_v54 }
 0x166   : > { %v450_v16 = vpop.f32.mrb[0].mxu0 }
 0x167   : > { %v454_v17 = vadd.f32 %v450_v16, %v375_v13  ;;  %v850_v18 = vpop.f32.mrb[1].mxu0 }
 0x169   : > { %v455_v19 = vmul.f32 %v454_v17, %v365_v15 }
 0x16b   : > { %983 = vtanh.f32 %v455_v19 }
 0x175   : > { %v984_v20 = vpop.eup %983 }
 0x176   : > { %v457_v22 = vmul.f32 %v984_v20, %v365_v15 }
 0x178   : > { %v458_v23 = vadd.f32 %v457_v22, %v366_v21 }
 0x17a   : > { %465 = vrot.lane.b32.xlu0 %v458_v23, %s1243_s18 }
 0x17e   : > { %460 = vrot.lane.b32.xlu0 %v373_v24, %s1244_s21 }
 0x182   : > { %483 = vrot.lane.b32.xlu0 %v372_v10, %s1245_s26 }
 0x1ec   : > { %v466_v25 = vpop.permute.xlu0 %465 }
 0x1ed   : > { %v468_v26 = vmul.f32 %v466_v25, %v458_v23 }
 0x1ef   : > { %470 = vrot.lane.b32.xlu1 %v468_v26, %s1244_s21 }
 0x1f0   : > { %v461_v27 = vpop.permute.xlu0 %460 }
 0x1f1   : > { %v463_v28 = vmul.f32 %v461_v27, %v458_v23 }
 0x1f4   : > { %v484_v35 = vpop.permute.xlu0 %483 }
 0x261   : > { %v471_v29 = vpop.permute.xlu1 %470 }
 0x262   : > { %v473_v30 = vadd.f32 %v471_v29, %v463_v28 }
 0x264   : > { %985 = vtanh.f32 %v473_v30  ;;  %v487_v50 = vsel %vm1529_vm6, %v473_v30, %v461_v27 }
 0x26e   : > { %v986_v31 = vpop.eup %985 }
 0x26f   : > { %476 = vrot.lane.b32.xlu1 %v986_v31, %s1243_s18 }
 0x2e1   : > { %v477_v34 = vpop.permute.xlu1 %476 }
 0x2e2   : > { %v479_v36 = vmul.f32 %v477_v34, %v458_v23 }
 0x2e4   : > { %v486_v38 = vsel %vm1529_vm6, %v479_v36, %v484_v35 }
 0x2e5   : > { %489 = vrot.lane.b32.xlu1 %v486_v38, %s1244_s21 }
 0x357   : > { %v490_v39 = vpop.permute.xlu1 %489 }
 0x358   : > { %492 = vst.msk [vmem:[%s1515_s11] sm:$0xff] %vm380_vm2, %v490_v39  ;;  %860 = vmatmul.mubr.msk.f32.vlgmr.msra.gmra.mrb[0].mxu1 %vm380_vm2, %v490_v39 }
 0x42b   : > { %v568_v41 = vpop.f32.mrb[0].mxu1 }
 0x42c   : > { %v572_v42 = vadd.f32 %v816_v40, %v568_v41  ;;  %v861_v43 = vpop.f32.mrb[1].mxu1 }
 0x42e   : > { %v573_v44 = vmul.f32 %v572_v42, %v365_v15 }
 0x430   : > { %987 = vtanh.f32 %v573_v44 }
 0x43a   : > { %v988_v45 = vpop.eup %987 }
 0x43b   : > { %v575_v46 = vmul.f32 %v988_v45, %v365_v15 }
 0x43d   : > { %v576_v47 = vadd.f32 %v575_v46, %v366_v21 }
 0x43f   : > { %579 = vrot.lane.b32.xlu0 %v576_v47, %s1243_s18  ;;  %v577_v51 = vmul.f32 %v576_v47, %v487_v50 }
 0x4b1   : > { %v580_v48 = vpop.permute.xlu0 %579 }
 0x4b2   : > { %v582_v49 = vmul.f32 %v580_v48, %v576_v47 }
 0x4b4   : > { %584 = vrot.lane.b32.xlu1 %v582_v49, %s1244_s21 }
 0x526   : > { %v585_v52 = vpop.permute.xlu1 %584 }
 0x527   : > { %v587_v53 = vadd.f32 %v585_v52, %v577_v51 }
 0x529   : > { %989 = vtanh.f32 %v587_v53  ;;  %v598_v56 = vsel %vm596_vm7, %v587_v53, %v487_v50 }
 0x533   : > { %v990_v55 = vpop.eup %989 }
 0x534   : > { %590 = vrot.lane.b32.xlu0 %v990_v55, %s1243_s18 }
 0x538   : > { %607 = vrot.lane.b32.xlu0 %v598_v56, %s1245_s26  ;;  %s1553_s26 = scalar_lea.hbm %s1658_s5, %s829_s30 }
 0x5a6   : > { %v591_v57 = vpop.permute.xlu0 %590 }
 0x5a7   : > { %v593_v58 = vmul.f32 %v591_v57, %v576_v47 }
 0x5a9   : > { %v597_v59 = vsel %vm596_vm7, %v593_v58, %v486_v38 }
 0x5aa   : > { %600 = vrot.lane.b32.xlu1 %v597_v59, %s1244_s21  ;;  %v608_v60 = vpop.permute.xlu0 %607  ;;  %s1087_s21 = scalar_lea.vmem %s643_s28, 128 }
 0x5ab   : > { %610 = vst.msk [vmem:[#allocation13] sm:$0xff] %vm380_vm2, %v608_v60  ;;  %p1088_p13 = scmp.ne.s32.totalorder %s643_s28, %s1087_s21  ;;  %p1095_p11 = scmp.lt.s32.totalorder %s1087_s21, %s1087_s21 }
 0x5ad   : > { %p1089_p2 = pnand %p1088_p13, %p1694_p0  ;;  %p1096_p10 = por %p1095_p11, %p1094_p9 }
 0x5af   : > { %p1090_p3 = pneg %p1089_p2 }
 0x5b1   : > { %p1097_p1 = pnand %p1096_p10, %p1090_p3 }
 0x61c   : > { %v601_v61 = vpop.permute.xlu1 %600 }
 0x61d   : > { %818 = vst.msk [vmem:[%s1515_s11 + $0x8] sm:$0xff] %vm380_vm2, %v601_v61  ;;  %605 = vst.msk [vmem:[#allocation11] sm:$0xff] %vm380_vm2, %v601_v61 }
 0x61e   : > { %1100 = shalt.err (!%p1097_p1)
}
 0x61f   : > { %s1101_s20 = scalar_lea.hbm %s1659_s6, 128 }
 0x620   : > { %p1102_p4 = scmp.ne.s32.totalorder %s1659_s6, %s1101_s20  ;;  %p1107_p12 = scmp.lt.u32.totalorder %s1101_s20, %s1659_s6 }
 0x622   : > { %p1103_p8 = pnand %p1102_p4, %p1694_p0 }
 0x624   : > { %p1104_p7 = pneg %p1103_p8 }
 0x626   : > { %p1109_p5 = pnand %p1107_p12, %p1104_p7 }
 0x628   : > { %1112 = shalt.err (!%p1109_p5)
}
 0x629   : > { %886 = dma.vmem_to_hbm [thread:$0]  (%p1694_p0), %s643_s28, 128, %s1659_s6, [#allocation12]  }
 0x62a   : > { %s612_s8 = scalar_lea.sflag [#allocation6], %s1501_s27  ;;  %s1113_s18 = scalar_lea.vmem %s1555_s16, 256 }
 0x62b   : > { %p1114_p6 = scmp.ne.s32.totalorder %s1555_s16, %s1113_s18  ;;  %p1695_p13 = scmp.ne.s32.totalorder %s1678_s22, 0 }
 0x62c   : > { %s1248_s21 = smov [#allocation10]  }
 0x62d   : > { %p1115_p2 = pnand %p1114_p6, %p1695_p13  ;;  %s1117_s14 = sshll.u32 %s1248_s21, 4  ;;  %s1118_s14 = int_to_ptr.vmem [resolvable:$false] %s1117_s14 }
 0x62e   : > { %s1119_s10 = scalar_lea.vmem %s1118_s14, 512  ;;  %p1120_p9 = scmp.lt.s32.totalorder %s1555_s16, %s1118_s14 }
 0x62f   : > { %p1116_p3 = pneg %p1115_p2  ;;  %p1121_p11 = scmp.lt.s32.totalorder %s1119_s10, %s1113_s18 }
 0x631   : > { %p1122_p10 = por %p1121_p11, %p1120_p9 }
 0x633   : > { %p1123_p1 = pnand %p1122_p10, %p1116_p3 }
 0x635   : > { %1126 = shalt.err (!%p1123_p1)
}
 0x636   : > { %s1127_s28 = scalar_lea.hbm %s1553_s26, 256  ;;  %s1131_s2 = scalar_lea.hbm %s1658_s5, 768 }
 0x637   : > { %p1128_p4 = scmp.ne.s32.totalorder %s1553_s26, %s1127_s28  ;;  %p1132_p12 = scmp.lt.u32.totalorder %s1553_s26, %s1658_s5 }
 0x638   : > { %p1133_p5 = scmp.lt.u32.totalorder %s1131_s2, %s1127_s28  ;;  %p1135_p2 = scmp.lt.u32.totalorder %s1127_s28, %s1553_s26 }
 0x639   : > { %p1129_p8 = pnand %p1128_p4, %p1695_p13 }
 0x63a   : > { %p1134_p6 = por %p1133_p5, %p1132_p12 }
 0x63b   : > { %p1130_p7 = pneg %p1129_p8 }
 0x63c   : > { %p1136_p3 = por %p1135_p2, %p1134_p6 }
 0x63e   : > { %p1137_p9 = pnand %p1136_p3, %p1130_p7 }
 0x640   : > { %1140 = shalt.err (!%p1137_p9)
}
 0x641   : > { %s1249_s30 = smov 128   ;;  %s1250_s9 = smov 8  }
 0x642   : > { %884 = dma.vmem_to_hbm [thread:$0]  (%p1695_p13), %s1555_s16, 256, %s1553_s26, %s612_s8, %s1249_s30, %s1249_s30, %s1250_s9  }
 0x643   : > { %s1141_s18 = scalar_lea.vmem %s1560_s24, 128  ;;  %p1148_p4 = scmp.lt.s32.totalorder %s1560_s24, %s1560_s24 }
 0x644   : > { %p1142_p11 = scmp.ne.s32.totalorder %s1560_s24, %s1141_s18  ;;  %p1149_p8 = scmp.lt.s32.totalorder %s1141_s18, %s1141_s18 }
 0x646   : > { %p1143_p10 = pnand %p1142_p11, %p1694_p0  ;;  %p1150_p7 = por %p1149_p8, %p1148_p4 }
 0x648   : > { %p1144_p1 = pneg %p1143_p10 }
 0x64a   : > { %p1151_p12 = pnand %p1150_p7, %p1144_p1 }
 0x64c   : > { %1154 = shalt.err (!%p1151_p12)
}
 0x64d   : > { %s1155_s10 = scalar_lea.hbm %s1660_s7, 128 }
 0x64e   : > { %p1156_p13 = scmp.ne.s32.totalorder %s1660_s7, %s1155_s10  ;;  %p1161_p2 = scmp.lt.u32.totalorder %s1155_s10, %s1660_s7 }
 0x650   : > { %p1157_p5 = pnand %p1156_p13, %p1694_p0 }
 0x652   : > { %p1158_p6 = pneg %p1157_p5 }
 0x654   : > { %p1163_p3 = pnand %p1161_p2, %p1158_p6 }
 0x656   : > { %1166 = shalt.err (!%p1163_p3)
}
 0x657   : > { %888 = dma.vmem_to_hbm [thread:$0]  (%p1694_p0), %s1560_s24, 128, %s1660_s7, [#allocation12]  }
 0x658   : > { %1202 = dma.done.wait (%p1694_p0), [#allocation12], 256  }
 0x659   : > { %1204 = vsyncadd (%p1694_p0), [#allocation12], 4294967040 }
 0x65a PF: > { %s1696_s20 = sld [smem:[#allocation19_spill]]  ;;  %s1697_s11 = sld [smem:[#allocation20_spill]] }
 0x65b   : > { %p918_p9 = scmp.ge.s32.totalorder %s1231_s0, 2 }
 0x660   : > { %s675_s2 = sand.u32 1, %s1696_s20   ;;  %p1698_p11 = scmp.ne.s32.totalorder %s1697_s11, 0 }
 0x661   : > { %s676_s23 = scalar_lea.sflag [#allocation6], %s675_s2 }
 0x662   : > { %p906_p10 = pnand %p918_p9, %p1698_p11 }
 0x664   : > { %1206 = dma.done.wait (!%p906_p10), %s676_s23, 256  }
 0x665   : > { %1208 = vsyncadd (!%p906_p10), %s676_s23, 4294967040  ;;  %s30_s0 = sadd.s32 1, %s1231_s0   ;;  %s1699_s11 = smov %s1215_s12 }
 0x666   : > { %p27_p1 = scmp.ge.s32.totalorder %s30_s0, 5   ;;  %s1700_s12 = smov %s1219_s13 }
 0x667   : > { %s1701_s13 = smov %s1496_s25  ;;  %s1702_s14 = smov %s1227_s15 }
 0x668   : > { %s1703_s15 = smov %s1705_s17  ;;  %29 = sbr.rel (!%p27_p1) target bundleno = 20 (0x14), region = 117 }
 0x66f   :  { %681 = vsyncpa [#allocation5], 1 }
 0x670   :  { %683 = vsyncpa [#allocation5 + $0x1], 1 }
 0x671   :  { %684 = vsyncpa [#allocation8], 1 }
 0x672   :  { %685 = vsyncpa [#allocation6], 1 }
 0x673   :  { %687 = vsyncpa [#allocation6 + $0x1], 1 }
 0x674   :  { %688 = vsyncpa [#allocation12], 1 }

</bundles_post_ra>
